<compile_context>
chip_gen: v6e
topology: v6e:2x2x1
jax: 0.10.0
libtpu: 0.0.40
codegen_flags: <defaults>
</compile_context>

<pallas_src>
import jax
import jax.numpy as jnp
import numpy as np
from jax.experimental import pallas as pl
from jax.experimental.pallas import tpu as pltpu

_LANE = 128
_MAX_COLS = 2048  # widest lane-dense row we bother with


def _copy_kernel(y_ref, o_ref):
    # Pure pass-through of the current lane-dense tile.
    o_ref[...] = y_ref[...]


def _sublane_multiple(dtype) -> int:
    """Native packed-tile row multiple: 8 for f32, 16 for bf16, 32 for int8/fp8."""
    itemsize = jnp.dtype(dtype).itemsize
    return max(8, 32 // max(1, itemsize))


def _block_bytes_cap() -> int:
    """Per-block byte cap (peak VMEM ~= 4x block: double-buffered in + out)."""
    try:
        kind = jax.devices()[0].device_kind.lower()
    except Exception:
        kind = ""
    if "v6" in kind or "v7" in kind:
        return 6 * 1024 * 1024   # peak ~24 MiB, under the 32 MiB scoped default
    return 3 * 1024 * 1024       # v5e / unknown: peak ~12 MiB, under 16 MiB default


def _lane_dense_view(n_body: int, itemsize: int, cap: int) -> tuple[int, int]:
    """Factor a 128-multiple element count into (rows, cols), cols a wide 128-multiple."""
    cols = _LANE
    while (n_body % (cols * 2) == 0
           and cols * 2 <= _MAX_COLS
           and cols * 2 * itemsize <= cap):
        cols *= 2
    return n_body // cols, cols


def _pick_block_rows(rows: int, cols: int, itemsize: int, sub: int, cap: int) -> int:
    """Largest row-block under the byte cap; dtype-aware sublane multiple when tiling."""
    max_rows = max(1, cap // (cols * itemsize))
    if rows <= max_rows:
        return rows
    return max(sub, (max_rows // sub) * sub)


def _pallas_copy_2d(y2: jnp.ndarray) -> jnp.ndarray:
    rows, cols = y2.shape
    itemsize = y2.dtype.itemsize
    cap = _block_bytes_cap()
    sub = _sublane_multiple(y2.dtype)
    block_rows = _pick_block_rows(rows, cols, itemsize, sub, cap)
    grid = (pl.cdiv(rows, block_rows),)
    return pl.pallas_call(
        _copy_kernel,
        out_shape=jax.ShapeDtypeStruct((rows, cols), y2.dtype),
        grid=grid,
        in_specs=[pl.BlockSpec((block_rows, cols), lambda i: (i, 0))],
        out_specs=pl.BlockSpec((block_rows, cols), lambda i: (i, 0)),
        cost_estimate=pl.CostEstimate(
            flops=0,
            transcendentals=0,
            bytes_accessed=2 * rows * cols * itemsize,
        ),
        # "parallel" is a no-op on single-TC chips; CORE_PARALLEL on v7x could
        # shard the copy across both TCs, but is left off for portability.
        compiler_params=pltpu.CompilerParams(
            dimension_semantics=("parallel",),
        ),
    )(y2)


def ground_truth_copy_pallas(y: jnp.ndarray) -> jnp.ndarray:
    """Materialize a fresh copy of y with a lane-dense tiled Pallas kernel."""
    n = y.size
    flat = y.reshape(-1)
    if n < _LANE:
        # Too small for a lane-dense tile; a Pallas launch costs more than the copy.
        return flat.reshape(y.shape)
    itemsize = y.dtype.itemsize
    cap = _block_bytes_cap()
    n_body = (n // _LANE) * _LANE
    rows, cols = _lane_dense_view(n_body, itemsize, cap)
    body2 = flat[:n_body].reshape(rows, cols)   # wrapper-side layout plumbing
    out_body = _pallas_copy_2d(body2).reshape(-1)
    if n_body == n:
        return out_body.reshape(y.shape)
    # Non-128-multiple sizes: tiny (<128 elem) tail copied by XLA and stitched.
    return jnp.concatenate([out_body, flat[n_body:]], axis=0).reshape(y.shape)


def ground_truth_forward(x: jnp.ndarray, y: jnp.ndarray,
                         *, force_pallas_copy: bool = False) -> jnp.ndarray:
    """Reproduces GroundTruth.forward(x, y) -> y.  x is accepted but ignored.

    Default path returns y directly (fastest possible: zero HBM traffic, zero
    launch overhead).  Set force_pallas_copy=True if the contract requires a
    materialized new buffer.
    """
    del x  # unused, same as the reference forward
    if not force_pallas_copy:
        return y
    return ground_truth_copy_pallas(y)


if __name__ == "__main__":
    key = jax.random.PRNGKey(0)
    kx, ky, kw, kb = jax.random.split(key, 4)

    # Deterministic (unused) parameters mirroring nn.Linear(1, 1).
    linear_weight = jax.random.normal(kw, (1, 1), dtype=jnp.float32)  # unused
    linear_bias = jax.random.normal(kb, (1,), dtype=jnp.float32)      # unused

    # Small shapes: batch=2, channels=4, spatial=16 (NCHW).
    x = jax.random.normal(kx, (2, 4, 16, 16), dtype=jnp.float32)
    y = jax.random.normal(ky, (2, 4, 16, 16), dtype=jnp.float32)

    # Snapshot reference values before calling.
    y_host = np.asarray(jax.device_get(y))

    out_fast = ground_truth_forward(x, y)                              # elided path
    out_pallas = ground_truth_forward(x, y, force_pallas_copy=True)    # Pallas kernel
    out_fast, out_pallas = jax.block_until_ready((out_fast, out_pallas))

    assert out_fast.shape == y.shape and out_fast.dtype == y.dtype
    assert out_pallas.shape == y.shape and out_pallas.dtype == y.dtype
    assert np.array_equal(np.asarray(jax.device_get(out_fast)), y_host)
    assert np.array_equal(np.asarray(jax.device_get(out_pallas)), y_host)
    print("KERNEL_OK")
</pallas_src>

<mosaic_0001>
module attributes {stable_mosaic.version = 11 : i64} {
  func.func @_copy_kernel(%arg0: i32, %arg1: memref<1x2048xf32, #tpu.memory_space<vmem>>, %arg2: memref<1x2048xf32, #tpu.memory_space<vmem>>) attributes {dimension_semantics = [#tpu.dimension_semantics<parallel>], iteration_bounds = array<i64: 1>, scalar_prefetch = 0 : i64, scratch_operands = 0 : i64, tpu.core_type = #tpu.core_type<tc>, window_params = [{transform_indices = @transform_0, window_bounds = array<i64: 1, 2048>}, {transform_indices = @transform_1, window_bounds = array<i64: 1, 2048>}]} {
    %c0 = arith.constant 0 : index
    %c0_0 = arith.constant 0 : index
    %0 = vector.load %arg1[%c0, %c0_0] : memref<1x2048xf32, #tpu.memory_space<vmem>>, vector<1x2048xf32>
    %c0_1 = arith.constant 0 : index
    %c0_2 = arith.constant 0 : index
    %1 = vector.load %arg2[%c0_1, %c0_2] : memref<1x2048xf32, #tpu.memory_space<vmem>>, vector<1x2048xf32>
    tpu.vector_store %arg2[%c0_1, %c0_2], %0 {strides = array<i32>} : memref<1x2048xf32, #tpu.memory_space<vmem>>, vector<1x2048xf32>,
    return
  }
  func.func @transform_0(%arg0: i32) -> (i32, i32) {
    %c0_i32 = arith.constant 0 : i32
    %c0_i32_0 = arith.constant 0 : i32
    return %arg0, %c0_i32 : i32, i32
  }
  func.func @transform_1(%arg0: i32) -> (i32, i32) {
    %c0_i32 = arith.constant 0 : i32
    %c0_i32_0 = arith.constant 0 : i32
    return %arg0, %c0_i32 : i32, i32
  }
}

</mosaic_0001>

<bundles_post_ra>
// kernel: tpu_custom_call.1
= control target key start
LH: loop header
LB: loop body
LE: loop exit
PB: predicated region body
PF: predicated region fallthrough
CT: control target
= control target key end

     0   :  { %6 = vsyncpa [#allocation3], 0  ;;  %s104_s0 = inlined_call_operand.hbm [shape: f32[1,2048], index: 0, kind: input, shape index: {}]   ;;  %s105_s1 = inlined_call_operand.hbm [shape: f32[1,2048], index: 1, kind: output, shape index: {}]  }
   0x1   :  { %7 = vsyncpa [#allocation4], 0  ;;  %s86_s6 = smov [#allocation2]  }
   0x2   :  { %s14_s7 = sshll.u32 %s86_s6, 4  ;;  %s15_s7 = int_to_ptr.vmem [resolvable:$true] %s14_s7 }
   0x3   :  { %s50_s8 = scalar_lea.vmem %s15_s7, 256  ;;  %p55_p1 = scmp.lt.s32.totalorder %s15_s7, %s15_s7 }
   0x4   :  { %p51_p0 = scmp.ne.s32.totalorder %s15_s7, %s50_s8  ;;  %p56_p2 = scmp.lt.s32.totalorder %s50_s8, %s50_s8 }
   0x6   :  { %p57_p3 = por %p56_p2, %p55_p1 }
   0x8   :  { %p58_p4 = pnand %p57_p3, %p51_p0 }
   0xa   :  { %61 = shalt.err (!%p58_p4)
}
   0xb   :  { %17 = dma.hbm_to_vmem [thread:$0]  %s104_s0, 256, %s15_s7, [#allocation3]  }
   0xc   :  { %82 = dma.done.wait [#allocation3], 256  }
   0xd   :  { %83 = vsyncadd [#allocation3], 4294967040  ;;  %s87_s11 = smov [#allocation5]   ;;  %v21_v0 = vld [vmem:[#allocation2] sm:$0xff]  ;;  %v22_v1 = vld [vmem:[#allocation2 + $0x8] sm:$0xff] }
   0xe   :  { %s31_s12 = sshll.u32 %s87_s11, 4  ;;  %23 = vst [vmem:[#allocation5] sm:$0xff] %v21_v0  ;;  %24 = vst [vmem:[#allocation5 + $0x8] sm:$0xff] %v22_v1  ;;  %s32_s12 = int_to_ptr.vmem [resolvable:$true] %s31_s12 }
   0xf   :  { %s62_s13 = scalar_lea.vmem %s32_s12, 256  ;;  %p67_p6 = scmp.lt.s32.totalorder %s32_s12, %s32_s12 }
  0x10   :  { %p63_p5 = scmp.ne.s32.totalorder %s32_s12, %s62_s13  ;;  %p68_p7 = scmp.lt.s32.totalorder %s62_s13, %s62_s13 }
  0x12   :  { %p69_p8 = por %p68_p7, %p67_p6 }
  0x14   :  { %p70_p9 = pnand %p69_p8, %p63_p5 }
  0x16   :  { %73 = shalt.err (!%p70_p9)
}
  0x17   :  { %34 = dma.vmem_to_hbm [thread:$0]  %s32_s12, 256, %s105_s1, [#allocation4]  }
  0x18   :  { %84 = dma.done.wait [#allocation4], 256  }
  0x19   :  { %85 = vsyncadd [#allocation4], 4294967040 }
  0x1a   :  { %38 = vsyncpa [#allocation3], 1 }
  0x1b   :  { %39 = vsyncpa [#allocation4], 1 }

</bundles_post_ra>
